<compile_context>
chip_gen: v5e
topology: v5e:2x2
jax: 0.10.0
libtpu: 0.0.40
codegen_flags: <defaults>
</compile_context>

<pallas_src>
import functools

import jax
import jax.numpy as jnp
from jax.experimental import pallas as pl
from jax.experimental.pallas import tpu as pltpu


def _round_up(x, m):
    return (x + m - 1) // m * m


def _self_output_kernel(hs_ref, inp_ref, w_ref, b_ref, gamma_ref, beta_ref,
                        out_ref, *, eps, inv_h):
    # hs_ref/inp_ref: (TM, H) row tiles in the activation dtype (bf16 feeds the
    # MXU directly); w_ref: (H, H) VMEM-resident W^T in the activation dtype;
    # b/gamma/beta: (1, H) pre-cast to f32 in the wrapper.
    y = jnp.dot(hs_ref[...], w_ref[...], preferred_element_type=jnp.float32)
    z = y + b_ref[...] + inp_ref[...].astype(jnp.float32)

    # Fused single-pass statistics: mean = E[z], var = E[z^2] - E[z]^2.
    s1 = jnp.sum(z, axis=-1, keepdims=True)
    s2 = jnp.sum(z * z, axis=-1, keepdims=True)
    mean = s1 * inv_h
    var = jnp.maximum(s2 * inv_h - mean * mean, 0.0)

    norm = (z - mean) * jax.lax.rsqrt(var + eps)
    out_ref[...] = (norm * gamma_ref[...] + beta_ref[...]).astype(out_ref.dtype)


def distil_self_output(hidden_states, input_tensor, w_t, b, gamma, beta,
                       *, eps=1e-12, tm=512):
    """y = LayerNorm(hidden_states @ w_t + b + input_tensor)  (inference path).

    hidden_states, input_tensor: (B, S, H); w_t: (H, H) = W.T (nn.Linear weight
    transposed); b / gamma / beta: (H,).
    """
    B, S, H = hidden_states.shape
    N = B * S
    act_dtype = hidden_states.dtype

    hs = hidden_states.reshape(N, H)
    inp = input_tensor.reshape(N, H)

    # Feed the MXU in the activation dtype (single cast in the wrapper); the
    # kernel accumulates in f32 regardless.
    w_t = w_t.astype(act_dtype)

    # Small per-lane vectors: pre-cast once to the f32 LN compute dtype so the
    # kernel body never re-casts them per grid step.
    b2 = b.reshape(1, H).astype(jnp.float32)
    g2 = gamma.reshape(1, H).astype(jnp.float32)
    be2 = beta.reshape(1, H).astype(jnp.float32)

    # Row tile: as large as requested (lane-dense (tm, H) MXU tile), aligned
    # to sublane packing for the dtype, but capped at ~N/2 so the row grid has
    # at least 2 steps (keeps both v7x TensorCores busy).  No wrapper padding:
    # grid = cdiv(N, tm_eff) and Pallas masks the partial last block's writes.
    row_align = 16 if act_dtype == jnp.bfloat16 else 8
    if N <= row_align:
        tm_eff = N                                       # single full-extent block
    else:
        half = _round_up(pl.cdiv(N, 2), row_align)
        tm_eff = min(_round_up(tm, row_align), half)
    grid = (pl.cdiv(N, tm_eff),)

    bpe = act_dtype.itemsize
    tile_bytes = tm_eff * H * bpe
    w_bytes = H * H * bpe
    # 3 row streams double-buffered + double-buffered resident weight + the
    # small f32 vectors, plus compiler headroom; capped at 48 MiB (v7x-safe).
    need = 3 * 2 * tile_bytes + 2 * w_bytes + 6 * H * 4
    vmem_limit = int(min(max(need + (8 << 20), 32 << 20), 48 << 20))

    cost = pl.CostEstimate(
        flops=2 * N * H * H + 10 * N * H,
        transcendentals=N,
        bytes_accessed=3 * N * H * bpe + w_bytes + 3 * H * 4,
    )

    out = pl.pallas_call(
        functools.partial(_self_output_kernel, eps=eps, inv_h=1.0 / H),
        out_shape=jax.ShapeDtypeStruct((N, H), act_dtype),
        grid_spec=pltpu.PrefetchScalarGridSpec(
            num_scalar_prefetch=0,
            grid=grid,
            in_specs=[
                pl.BlockSpec((tm_eff, H), lambda i: (i, 0)),   # hidden_states rows
                pl.BlockSpec((tm_eff, H), lambda i: (i, 0)),   # residual rows
                pl.BlockSpec((H, H), lambda i: (0, 0)),        # W^T, VMEM-resident
                pl.BlockSpec((1, H), lambda i: (0, 0)),        # dense bias (f32)
                pl.BlockSpec((1, H), lambda i: (0, 0)),        # LN gamma (f32)
                pl.BlockSpec((1, H), lambda i: (0, 0)),        # LN beta (f32)
            ],
            out_specs=pl.BlockSpec((tm_eff, H), lambda i: (i, 0)),
        ),
        compiler_params=pltpu.CompilerParams(
            dimension_semantics=("parallel",),
            vmem_limit_bytes=vmem_limit,
        ),
        cost_estimate=cost,
    )(hs, inp, w_t, b2, g2, be2)

    return out.reshape(B, S, H)


def _reference(hidden_states, input_tensor, w_t, b, gamma, beta, eps=1e-12):
    y = hidden_states.astype(jnp.float32) @ w_t.astype(jnp.float32) + b
    z = y + input_tensor.astype(jnp.float32)
    mean = jnp.mean(z, axis=-1, keepdims=True)
    var = jnp.mean((z - mean) ** 2, axis=-1, keepdims=True)
    out = (z - mean) / jnp.sqrt(var + eps) * gamma + beta
    return out.astype(hidden_states.dtype)


def _make_case(key, B, S, H):
    k_hs, k_in, k_w, k_b, k_g, k_be = jax.random.split(key, 6)
    hidden_states = jax.random.normal(k_hs, (B, S, H), dtype=jnp.float32)
    input_tensor = jax.random.normal(k_in, (B, S, H), dtype=jnp.float32)
    # nn.Linear(H, H): weight (H_out, H_in), bias (H_out,).
    w = jax.random.normal(k_w, (H, H), dtype=jnp.float32) * (1.0 / jnp.sqrt(H))
    b = jax.random.normal(k_b, (H,), dtype=jnp.float32) * 0.02
    w_t = w.T
    gamma = 1.0 + 0.1 * jax.random.normal(k_g, (H,), dtype=jnp.float32)
    beta = 0.05 * jax.random.normal(k_be, (H,), dtype=jnp.float32)
    return hidden_states, input_tensor, w_t, b, gamma, beta


if __name__ == "__main__":
    eps = 1e-12
    key = jax.random.PRNGKey(0)
    k1, k2 = jax.random.split(key, 2)

    # Case 1: small config (B*S=20, H=128). N not a multiple of the row tile,
    # so the masked partial-last-block path is exercised (no wrapper padding).
    hs, inp, w_t, b, g, be = _make_case(k1, 2, 10, 128)
    ref = _reference(hs, inp, w_t, b, g, be, eps=eps)

    out = distil_self_output(hs, inp, w_t, b, g, be, eps=eps)
    out = jax.block_until_ready(out)
    assert out.shape == hs.shape
    assert jnp.allclose(out, ref, atol=1e-4, rtol=1e-4), "mismatch vs reference"

    # Small tile override: multi-step grid + partial last block, same result.
    out2 = distil_self_output(hs, inp, w_t, b, g, be, eps=eps, tm=8)
    out2 = jax.block_until_ready(out2)
    assert jnp.allclose(out2, ref, atol=1e-4, rtol=1e-4), "mismatch (tiled) vs reference"

    # Case 2: larger rows / wider hidden (N=192, H=256), default tile.
    hs, inp, w_t, b, g, be = _make_case(k2, 2, 96, 256)
    ref = _reference(hs, inp, w_t, b, g, be, eps=eps)
    out3 = distil_self_output(hs, inp, w_t, b, g, be, eps=eps)
    out3 = jax.block_until_ready(out3)
    assert jnp.allclose(out3, ref, atol=1e-4, rtol=1e-4), "mismatch (large) vs reference"

    print("KERNEL_OK")
</pallas_src>

<mosaic_0001>
module attributes {stable_mosaic.version = 11 : i64} {
  func.func @_self_output_kernel(%arg0: i32, %arg1: memref<16x128xf32, #tpu.memory_space<vmem>>, %arg2: memref<16x128xf32, #tpu.memory_space<vmem>>, %arg3: memref<128x128xf32, #tpu.memory_space<vmem>>, %arg4: memref<1x128xf32, #tpu.memory_space<vmem>>, %arg5: memref<1x128xf32, #tpu.memory_space<vmem>>, %arg6: memref<1x128xf32, #tpu.memory_space<vmem>>, %arg7: memref<16x128xf32, #tpu.memory_space<vmem>>) attributes {dimension_semantics = [#tpu.dimension_semantics<parallel>], iteration_bounds = array<i64: 2>, scalar_prefetch = 0 : i64, scratch_operands = 0 : i64, tpu.core_type = #tpu.core_type<tc>, window_params = [{transform_indices = @transform_0, window_bounds = array<i64: 16, 128>}, {transform_indices = @transform_1, window_bounds = array<i64: 16, 128>}, {pipeline_mode = #tpu.pipeline_mode<synchronous>, transform_indices = @transform_2, window_bounds = array<i64: 128, 128>}, {pipeline_mode = #tpu.pipeline_mode<synchronous>, transform_indices = @transform_3, window_bounds = array<i64: 1, 128>}, {pipeline_mode = #tpu.pipeline_mode<synchronous>, transform_indices = @transform_4, window_bounds = array<i64: 1, 128>}, {pipeline_mode = #tpu.pipeline_mode<synchronous>, transform_indices = @transform_5, window_bounds = array<i64: 1, 128>}, {transform_indices = @transform_6, window_bounds = array<i64: 16, 128>}]} {
    %c0 = arith.constant 0 : index
    %c0_0 = arith.constant 0 : index
    %0 = vector.load %arg1[%c0, %c0_0] : memref<16x128xf32, #tpu.memory_space<vmem>>, vector<16x128xf32>
    %c0_1 = arith.constant 0 : index
    %c0_2 = arith.constant 0 : index
    %1 = vector.load %arg3[%c0_1, %c0_2] : memref<128x128xf32, #tpu.memory_space<vmem>>, vector<128x128xf32>
    %cst = arith.constant dense<0.000000e+00> : vector<16x128xf32>
    %2 = tpu.matmul %0, %1, %cst {dimension_numbers = #tpu.dot_dimension_numbers<[1], [0], [0], [1], [0, 0, 1, 1], [], []>} : vector<16x128xf32>, vector<128x128xf32>, vector<16x128xf32> -> vector<16x128xf32>
    %c0_3 = arith.constant 0 : index
    %c0_4 = arith.constant 0 : index
    %3 = vector.load %arg4[%c0_3, %c0_4] : memref<1x128xf32, #tpu.memory_space<vmem>>, vector<1x128xf32>
    %4 = vector.broadcast %3 : vector<1x128xf32> to vector<16x128xf32>
    %5 = arith.addf %2, %4 : vector<16x128xf32>
    %c0_5 = arith.constant 0 : index
    %c0_6 = arith.constant 0 : index
    %6 = vector.load %arg2[%c0_5, %c0_6] : memref<16x128xf32, #tpu.memory_space<vmem>>, vector<16x128xf32>
    %7 = arith.addf %5, %6 : vector<16x128xf32>
    %cst_7 = arith.constant dense<0.000000e+00> : vector<16xf32>
    %8 = vector.multi_reduction <add>, %7, %cst_7 [1] : vector<16x128xf32> to vector<16xf32>
    %9 = vector.shape_cast %8 : vector<16xf32> to vector<16x1xf32>
    %10 = arith.mulf %7, %7 : vector<16x128xf32>
    %cst_8 = arith.constant dense<0.000000e+00> : vector<16xf32>
    %11 = vector.multi_reduction <add>, %10, %cst_8 [1] : vector<16x128xf32> to vector<16xf32>
    %12 = vector.shape_cast %11 : vector<16xf32> to vector<16x1xf32>
    %cst_9 = arith.constant 7.812500e-03 : f32
    %13 = vector.broadcast %cst_9 : f32 to vector<16x1xf32>
    %14 = arith.mulf %9, %13 : vector<16x1xf32>
    %cst_10 = arith.constant 7.812500e-03 : f32
    %15 = vector.broadcast %cst_10 : f32 to vector<16x1xf32>
    %16 = arith.mulf %12, %15 : vector<16x1xf32>
    %17 = arith.mulf %14, %14 : vector<16x1xf32>
    %18 = arith.subf %16, %17 : vector<16x1xf32>
    %cst_11 = arith.constant 0.000000e+00 : f32
    %19 = vector.broadcast %cst_11 : f32 to vector<16x1xf32>
    %20 = arith.maximumf %18, %19 : vector<16x1xf32>
    %21 = vector.broadcast %14 : vector<16x1xf32> to vector<16x128xf32>
    %22 = arith.subf %7, %21 : vector<16x128xf32>
    %cst_12 = arith.constant 9.99999996E-13 : f32
    %23 = vector.broadcast %cst_12 : f32 to vector<16x1xf32>
    %24 = arith.addf %20, %23 : vector<16x1xf32>
    %25 = math.rsqrt %24 : vector<16x1xf32>
    %26 = vector.broadcast %25 : vector<16x1xf32> to vector<16x128xf32>
    %27 = arith.mulf %22, %26 : vector<16x128xf32>
    %c0_13 = arith.constant 0 : index
    %c0_14 = arith.constant 0 : index
    %28 = vector.load %arg5[%c0_13, %c0_14] : memref<1x128xf32, #tpu.memory_space<vmem>>, vector<1x128xf32>
    %29 = vector.broadcast %28 : vector<1x128xf32> to vector<16x128xf32>
    %30 = arith.mulf %27, %29 : vector<16x128xf32>
    %c0_15 = arith.constant 0 : index
    %c0_16 = arith.constant 0 : index
    %31 = vector.load %arg6[%c0_15, %c0_16] : memref<1x128xf32, #tpu.memory_space<vmem>>, vector<1x128xf32>
    %32 = vector.broadcast %31 : vector<1x128xf32> to vector<16x128xf32>
    %33 = arith.addf %30, %32 : vector<16x128xf32>
    %c0_17 = arith.constant 0 : index
    %c0_18 = arith.constant 0 : index
    %34 = vector.load %arg7[%c0_17, %c0_18] : memref<16x128xf32, #tpu.memory_space<vmem>>, vector<16x128xf32>
    tpu.vector_store %arg7[%c0_17, %c0_18], %33 {strides = array<i32>} : memref<16x128xf32, #tpu.memory_space<vmem>>, vector<16x128xf32>,
    return
  }
  func.func @transform_0(%arg0: i32) -> (i32, i32) {
    %c0_i32 = arith.constant 0 : i32
    %c0_i32_0 = arith.constant 0 : i32
    return %arg0, %c0_i32 : i32, i32
  }
  func.func @transform_1(%arg0: i32) -> (i32, i32) {
    %c0_i32 = arith.constant 0 : i32
    %c0_i32_0 = arith.constant 0 : i32
    return %arg0, %c0_i32 : i32, i32
  }
  func.func @transform_2(%arg0: i32) -> (i32, i32) {
    %c0_i32 = arith.constant 0 : i32
    %c0_i32_0 = arith.constant 0 : i32
    %c0_i32_1 = arith.constant 0 : i32
    return %c0_i32, %c0_i32_0 : i32, i32
  }
  func.func @transform_3(%arg0: i32) -> (i32, i32) {
    %c0_i32 = arith.constant 0 : i32
    %c0_i32_0 = arith.constant 0 : i32
    %c0_i32_1 = arith.constant 0 : i32
    return %c0_i32, %c0_i32_0 : i32, i32
  }
  func.func @transform_4(%arg0: i32) -> (i32, i32) {
    %c0_i32 = arith.constant 0 : i32
    %c0_i32_0 = arith.constant 0 : i32
    %c0_i32_1 = arith.constant 0 : i32
    return %c0_i32, %c0_i32_0 : i32, i32
  }
  func.func @transform_5(%arg0: i32) -> (i32, i32) {
    %c0_i32 = arith.constant 0 : i32
    %c0_i32_0 = arith.constant 0 : i32
    %c0_i32_1 = arith.constant 0 : i32
    return %c0_i32, %c0_i32_0 : i32, i32
  }
  func.func @transform_6(%arg0: i32) -> (i32, i32) {
    %c0_i32 = arith.constant 0 : i32
    %c0_i32_0 = arith.constant 0 : i32
    return %arg0, %c0_i32 : i32, i32
  }
}

</mosaic_0001>

<bundles_post_ra>
// kernel: tpu_custom_call.1
= control target key start
LH: loop header
LB: loop body
LE: loop exit
PB: predicated region body
PF: predicated region fallthrough
CT: control target
= control target key end

     0   :  { %s1228_s0 = inlined_call_operand.hbm [shape: f32[20,128], index: 0, kind: input, shape index: {}]   ;;  %s1229_s1 = inlined_call_operand.hbm [shape: f32[20,128], index: 1, kind: input, shape index: {}]   ;;  %s1230_s2 = inlined_call_operand.hbm [shape: f32[128,128], index: 2, kind: input, shape index: {}]   ;;  %s1231_s3 = inlined_call_operand.vmem [shape: f32[1,128], index: 3, kind: input, shape index: {}]   ;;  %s1232_s4 = inlined_call_operand.vmem [shape: f32[1,128], index: 4, kind: input, shape index: {}]   ;;  %s1233_s5 = inlined_call_operand.vmem [shape: f32[1,128], index: 5, kind: input, shape index: {}]   ;;  %s1234_s6 = inlined_call_operand.hbm [shape: f32[20,128], index: 6, kind: output, shape index: {}]  }
   0x1   :  { %1240 = sst [smem:[#allocation15_spill]] %s1230_s2 }
   0x2   :  { %11 = vsyncpa [#allocation3], 0 }
   0x3   :  { %13 = vsyncpa [#allocation3 + $0x1], 0 }
   0x4   :  { %14 = vsyncpa [#allocation6], 0 }
   0x5   :  { %16 = vsyncpa [#allocation6 + $0x1], 0 }
   0x6   :  { %17 = vsyncpa [#allocation4], 0 }
   0x7   :  { %19 = vsyncpa [#allocation4 + $0x1], 0  ;;  %s955_s21 = smov 0   ;;  %s957_s22 = smov 0  }
   0x8   :  { %s959_s23 = smov 0   ;;  %s961_s24 = smov 0  }
   0x9 LB: > { %s976_s25 = sadd.s32 4294967295, %s906_s24   ;;  %s596_s26 = sadd.s32 4294967294, %s906_s24   ;;  %s906_s24 = sphi %s961_s24, %s1258_s24   ;;  %s902_s23 = sphi %s959_s23, %s1262_s23   ;;  %s898_s22 = sphi %s957_s22, %s1261_s22   ;;  %s894_s21 = sphi %s955_s21, %s1260_s21  }
   0xa   : > { %s980_s27 = sadd.s32 1, %s906_s24   ;;  %s32_s28 = sadd.s32 1, %s902_s23 }
   0xb   : > { %1241 = sst [smem:[#allocation13_spill]] %s980_s27  ;;  %s29_s29 = ssub.s32 %s906_s24, %s980_s27 }
   0xc   : > { %p39_p0 = scmp.ne.s32.totalorder %s902_s23, %s898_s22  ;;  %p30_p1 = scmp.eq.s32.totalorder %s29_s29, 0 }
   0xd   : > { %p40_p2 = scmp.eq.s32.totalorder %s906_s24, 0  ;;  %p45_p3 = scmp.ne.s32.totalorder %s898_s22, %s894_s21 }
   0xe   : > { %p1239_p4 = scmp.eq.s32.totalorder %s976_s25, 0  ;;  %p179_p7 = scmp.eq.s32.totalorder %s976_s25, 1 }
   0xf   : > { %s992_s30 = scalar_select %p30_p1, %s902_s23, %s32_s28  }
  0x10   : > { %p994_p5 = por %p40_p2, %p39_p0  ;;  %p1000_p6 = por %p1239_p4, %p45_p3 }
  0x11   : > { %1242 = sst [smem:[#allocation14_spill]] %s992_s30  ;;  %p185_p8 = scmp.eq.s32.totalorder %s596_s26, 1 }
  0x12   : > { %p597_p9 = scmp.ge.s32.totalorder %s906_s24, 1  ;;  %p192_p10 = scmp.lt.s32.totalorder %s906_s24, 3 }
  0x13   : > { %p1007_p11 = por %p179_p7, %p39_p0  ;;  %p1011_p12 = por %p185_p8, %p45_p3 }
  0x14   : > { %p1015_p13 = pnand %p597_p9, %p192_p10  ;;  %s1248_s2 = sld [smem:[#allocation15_spill]] }
  0x15   : > { %s1245_s9 = scalar_select %p1007_p11, 1, 0 }
  0x16   : > { %s1246_s10 = scalar_select %p1011_p12, 1, 0 }
  0x17   : > { %p654_p1 = pneg %p1015_p13  ;;  %s908_s15 = smov [#allocation7]  }
  0x18   : > { %s205_s16 = sshll.u32 %s908_s15, 4  ;;  %s909_s17 = smov 128   ;;  %s206_s16 = int_to_ptr.vmem [resolvable:$true] %s205_s16 }
  0x19   : > { %p655_p0 = pnand %p654_p1, %p1239_p4  ;;  %s910_s18 = smov 8  }
  0x1a   : > { %s203_s14 = sshll.u32 %s1248_s2, 4  ;;  %p1235_p2 = scmp.ge.s32.totalorder %s906_s24, 2  ;;  %s204_s14 = int_to_ptr.hbm [resolvable:$true] %s203_s14 }
  0x1b   : > { %657 = dma.hbm_to_vmem [thread:$0]  (!%p655_p0), %s204_s14, 2048, %s206_s16, [#allocation6], %s909_s17, %s909_s17, %s910_s18  }
  0x1c   : > { %224 = sbr.rel (%p1235_p2) target bundleno = 106 (0x6a), region = 32 }
  0x21   : > { %227 = sbr.rel (!%p994_p5) target bundleno = 70 (0x46), region = 36  ;;  %s228_s19 = sand.u32 (%p994_p5), 1, %s902_s23  }
  0x22   : > { %s601_s20 = sshll.u32 (%p994_p5), %s906_s24, 1  ;;  %s600_s26 = sshll.u32 (%p994_p5), %s228_s19, 4 }
  0x23   : > { %s234_s28 = ssub.s32 (%p994_p5), 3, %s601_s20  ;;  %s1036_s14 = scalar_lea.sflag (%p994_p5), [#allocation3], %s228_s19 }
  0x24   : > { %p235_p3 = scmp.lt.s32.totalorder (%p994_p5), %s234_s28, 2  ;;  %s232_s15 = scalar_lea.vmem (%p994_p5), [#allocation2], %s600_s26 }
  0x26   : > { %s1264_s28 = smov (!%p235_p3, %s234_s28), 2 }
  0x27   : > { %s602_s29 = sshll.u32 %s1264_s28, 3 }
  0x28   : > { %s238_s12 = ssub.s32 16, %s602_s29 }
  0x29   : > { %s239_s13 = sshll.u32 %s238_s12, 4 }
  0x2a   : > { %240 = vsyncadd %s1036_s14, %s239_s13  ;;  %p1039_p7 = scmp.ne.s32.totalorder %s602_s29, 0  ;;  %s628_s17 = sshll.u32 %s906_s24, 4 }
  0x2b   : > { %s243_s2 = scalar_lea.hbm %s1228_s0, %s628_s17  ;;  %s1047_s30 = sshll.u32 %s232_s15, 4  ;;  %s248_s30 = int_to_ptr.vmem [resolvable:$true] %s1047_s30 }
  0x2c   : > { %s245_s19 = sshll.u32 %s243_s2, 4  ;;  %s1236_s26 = sshll.u32 %s1264_s28, 7  ;;  %s1050_s19 = int_to_ptr.hbm [resolvable:$true] %s245_s19 }
  0x2d   : > { %s743_s12 = sshra.s32 %s1050_s19, 4  ;;  %s745_s29 = sshrl.u32 %s1236_s26, 4  ;;  %s744_s12 = int_to_ptr.hbm [resolvable:$true] %s743_s12 }
  0x2e   : > { %s750_s13 = scalar_lea.hbm %s744_s12, %s745_s29  ;;  %s754_s15 = scalar_lea.hbm %s1228_s0, 24 }
  0x2f   : > { %p751_p8 = scmp.ne.s32.totalorder %s744_s12, %s750_s13  ;;  %p755_p1 = scmp.lt.s32.totalorder %s744_s12, %s1228_s0 }
  0x30   : > { %p756_p0 = scmp.lt.s32.totalorder %s754_s15, %s750_s13 }
  0x31   : > { %p752_p9 = pnand %p751_p8, %p1039_p7 }
  0x32   : > { %p757_p3 = por %p756_p0, %p755_p1 }
  0x33   : > { %p753_p10 = pneg %p752_p9 }
  0x35   : > { %p758_p2 = pnand %p757_p3, %p753_p10 }
  0x37   : > { %761 = shalt.err (!%p758_p2)
}
  0x38   : > { %s762_s26 = sshra.s32 %s248_s30, 4  ;;  %s911_s18 = smov [#allocation2]   ;;  %s763_s26 = int_to_ptr.vmem [resolvable:$true] %s762_s26 }
  0x39   : > { %s769_s27 = scalar_lea.vmem %s763_s26, %s745_s29  ;;  %s773_s17 = scalar_lea.vmem %s911_s18, 32 }
  0x3a   : > { %p770_p8 = scmp.ne.s32.totalorder %s763_s26, %s769_s27  ;;  %p775_p12 = scmp.lt.s32.totalorder %s773_s17, %s769_s27 }
  0x3c   : > { %p771_p9 = pnand %p770_p8, %p1039_p7 }
  0x3e   : > { %p772_p4 = pneg %p771_p9 }
  0x40   : > { %p777_p11 = pnand %p775_p12, %p772_p4 }
  0x42   : > { %780 = shalt.err (!%p777_p11)
}
  0x43   : > { %s912_s12 = smov 128   ;;  %s913_s13 = smov 8  }
  0x44   : > { %s1250_s15 = sshll.u32 %s1264_s28, 7 }
  0x45   : > { %253 = dma.hbm_to_vmem [thread:$0]  (%p1039_p7), %s1050_s19, %s1250_s15, %s248_s30, %s1036_s14, %s912_s12, %s912_s12, %s913_s13  }
  0x46 PF: > { %256 = sbr.rel (!%p994_p5) target bundleno = 106 (0x6a), region = 40  ;;  %s257_s27 = sand.u32 (%p994_p5), 1, %s906_s24  }
  0x47   : > { %s259_s26 = sand.u32 (%p994_p5), 1, %s902_s23   ;;  %s608_s20 = sshll.u32 (%p994_p5), %s906_s24, 1 }
  0x48   : > { %s607_s29 = sshll.u32 (%p994_p5), %s259_s26, 4  ;;  %s263_s2 = ssub.s32 (%p994_p5), 3, %s608_s20 }
  0x49   : > { %p264_p4 = scmp.lt.s32.totalorder (%p994_p5), %s263_s2, 2  ;;  %s1084_s30 = scalar_lea.sflag (%p994_p5), [#allocation6], %s257_s27 }
  0x4a   : > { %s261_s7 = scalar_lea.vmem (%p994_p5), [#allocation5], %s607_s29 }
  0x4b   : > { %s1266_s2 = smov (!%p264_p4, %s263_s2), 2 }
  0x4c   : > { %s609_s16 = sshll.u32 %s1266_s2, 3 }
  0x4d   : > { %s267_s18 = ssub.s32 16, %s609_s16 }
  0x4e   : > { %s268_s28 = sshll.u32 %s267_s18, 4 }
  0x4f   : > { %269 = vsyncadd %s1084_s30, %s268_s28  ;;  %p1087_p5 = scmp.ne.s32.totalorder %s609_s16, 0  ;;  %s629_s19 = sshll.u32 %s906_s24, 4 }
  0x50   : > { %s272_s13 = scalar_lea.hbm %s1229_s1, %s629_s19  ;;  %s1095_s15 = sshll.u32 %s261_s7, 4  ;;  %s277_s15 = int_to_ptr.vmem [resolvable:$true] %s1095_s15 }
  0x51   : > { %s274_s27 = sshll.u32 %s272_s13, 4  ;;  %s613_s26 = sshll.u32 %s1266_s2, 7  ;;  %s1098_s27 = int_to_ptr.hbm [resolvable:$true] %s274_s27 }
  0x52   : > { %s782_s29 = sshra.s32 %s1098_s27, 4  ;;  %s784_s20 = sshrl.u32 %s613_s26, 4  ;;  %s783_s29 = int_to_ptr.hbm [resolvable:$true] %s782_s29 }
  0x53   : > { %s789_s16 = scalar_lea.hbm %s783_s29, %s784_s20  ;;  %s793_s7 = scalar_lea.hbm %s1229_s1, 24 }
  0x54   : > { %p790_p11 = scmp.ne.s32.totalorder %s783_s29, %s789_s16  ;;  %p794_p7 = scmp.lt.s32.totalorder %s783_s29, %s1229_s1 }
  0x55   : > { %p795_p10 = scmp.lt.s32.totalorder %s793_s7, %s789_s16 }
  0x56   : > { %p791_p12 = pnand %p790_p11, %p1087_p5 }
  0x57   : > { %p796_p1 = por %p795_p10, %p794_p7 }
  0x58   : > { %p792_p2 = pneg %p791_p12 }
  0x5a   : > { %p797_p0 = pnand %p796_p1, %p792_p2 }
  0x5c   : > { %800 = shalt.err (!%p797_p0)
}
  0x5d   : > { %s801_s12 = sshra.s32 %s277_s15, 4  ;;  %s914_s18 = smov [#allocation5]   ;;  %s802_s12 = int_to_ptr.vmem [resolvable:$true] %s801_s12 }
  0x5e   : > { %s808_s13 = scalar_lea.vmem %s802_s12, %s784_s20  ;;  %s812_s28 = scalar_lea.vmem %s914_s18, 32 }
  0x5f   : > { %p809_p3 = scmp.ne.s32.totalorder %s802_s12, %s808_s13  ;;  %p814_p4 = scmp.lt.s32.totalorder %s812_s28, %s808_s13 }
  0x61   : > { %p810_p8 = pnand %p809_p3, %p1087_p5 }
  0x63   : > { %p811_p9 = pneg %p810_p8 }
  0x65   : > { %p816_p11 = pnand %p814_p4, %p811_p9 }
  0x67   : > { %819 = shalt.err (!%p816_p11)
}
  0x68   : > { %s915_s29 = smov 128   ;;  %s916_s16 = smov 8  }
  0x69   : > { %282 = dma.hbm_to_vmem [thread:$0]  (%p1087_p5), %s1098_s27, %s613_s26, %s277_s15, %s1084_s30, %s915_s29, %s915_s29, %s916_s16  }
  0x6a PF: > { %288 = sbr.rel (%p1015_p13) target bundleno = 470 (0x1d6), region = 44  ;;  %s1127_s20 = sand.u32 (!%p1015_p13), 1, %s898_s22  }
  0x6b   : > { %s1130_s7 = sshll.u32 (!%p1015_p13), %s1127_s20, 4  ;;  %s291_s19 = scalar_lea.sflag (!%p1015_p13), [#allocation3], %s1127_s20 }
  0x6c   : > { %s294_s17 = scalar_lea.vmem (!%p1015_p13), [#allocation2], %s1130_s7 }
  0x6f   : > { %877 = dma.done.wait (%p1000_p6), %s291_s19, 256  }
  0x70   : > { %879 = vsyncadd (%p1000_p6), %s291_s19, 4294967040  ;;  %s300_s11 = sand.u32 1, %s976_s25   ;;  %s304_s30 = scalar_lea.vmem [#allocation5], %s1130_s7 }
  0x71   : > { %s301_s2 = scalar_lea.sflag [#allocation6], %s300_s11 }
  0x72   : > { %881 = dma.done.wait (%p1000_p6), %s301_s2, 256  }
  0x73   : > { %883 = vsyncadd (%p1000_p6), %s301_s2, 4294967040  ;;  %p1252_p13 = scmp.eq.s32.totalorder %s976_s25, 0 }
  0x75   : > { %885 = dma.done.wait (%p1252_p13), [#allocation6], 2048   ;;  %p1253_p5 = pmov %p1252_p13 }
  0x76   : > { %v376_v0 = vld [vmem:[#allocation7 + $0x78] sm:$0xff]  ;;  %v375_v1 = vld [vmem:[#allocation7 + $0x70] sm:$0xff]  ;;  %v374_v2 = vld [vmem:[#allocation7 + $0x68] sm:$0xff]  ;;  %s343_s13 = scalar_lea.vmem [#allocation8], %s1130_s7  ;;  %s469_s18 = scalar_lea.sflag [#allocation4], %s1127_s20 }
  0x77   : > { %887 = vsyncadd (%p1253_p5), [#allocation6], 4294965248  ;;  %381 = vmatpush.msra.mxu0 %v376_v0  ;;  %631 = vmatpush.msra.mxu1 %v376_v0  ;;  %v373_v3 = vld [vmem:[#allocation7 + $0x60] sm:$0xff]  ;;  %v372_v4 = vld [vmem:[#allocation7 + $0x58] sm:$0xff]  ;;  %p1254_p6 = scmp.ne.s32.totalorder %s1245_s9, 0 }
  0x78   : > { %v371_v5 = vld [vmem:[#allocation7 + $0x50] sm:$0xff]  ;;  %v370_v6 = vld [vmem:[#allocation7 + $0x48] sm:$0xff]  ;;  %v369_v7 = vld [vmem:[#allocation7 + $0x40] sm:$0xff]  ;;  %s620_s28 = sshll.u32 (%p1254_p6), %s976_s25, 1 }
  0x79   : > { %382 = vmatpush.msra.mxu0 %v375_v1  ;;  %632 = vmatpush.msra.mxu1 %v375_v1  ;;  %v368_v8 = vld [vmem:[#allocation7 + $0x38] sm:$0xff]  ;;  %v367_v9 = vld [vmem:[#allocation7 + $0x30] sm:$0xff]  ;;  %v366_v10 = vld [vmem:[#allocation7 + $0x28] sm:$0xff]  ;;  %s477_s29 = ssub.s32 (%p1254_p6), 3, %s620_s28 }
  0x7a   : > { %v365_v11 = vld [vmem:[#allocation7 + $0x20] sm:$0xff]  ;;  %v364_v12 = vld [vmem:[#allocation7 + $0x18] sm:$0xff]  ;;  %v363_v13 = vld [vmem:[#allocation7 + $0x10] sm:$0xff]  ;;  %p478_p12 = scmp.lt.s32.totalorder (%p1254_p6), %s477_s29, 2 }
  0x7b   : > { %383 = vmatpush.msra.mxu0 %v374_v2  ;;  %633 = vmatpush.msra.mxu1 %v374_v2  ;;  %v362_v14 = vld [vmem:[#allocation7 + $0x8] sm:$0xff]  ;;  %v361_v15 = vld [vmem:[#allocation7] sm:$0xff] }
  0x7c   : > { %v359_v16 = vld [vmem:[%s294_s17] sm:$0xff]  ;;  %v360_v17 = vld [vmem:[%s294_s17 + $0x8] sm:$0xff] }
  0x7d   : > { %384 = vmatpush.msra.mxu0 %v373_v3  ;;  %634 = vmatpush.msra.mxu1 %v373_v3  ;;  %v706_v18 = vld [vmem:[%s1231_s3] ss:$0 sm:$0xff]  ;;  %v405_v25 = vld [vmem:[%s304_s30 + $0x8] sm:$0xff] }
  0x7e   : > { %v404_v20 = vld [vmem:[%s304_s30] sm:$0xff] }
  0x7f   : > { %385 = vmatpush.msra.mxu0 %v372_v4  ;;  %635 = vmatpush.msra.mxu1 %v372_v4  ;;  %v707_v53 = vld [vmem:[%s1232_s4] ss:$0 sm:$0xff] }
  0x80   : > { %v708_v56 = vld [vmem:[%s1233_s5] ss:$0 sm:$0xff] }
  0x81   : > { %386 = vmatpush.msra.mxu0 %v371_v5  ;;  %636 = vmatpush.msra.mxu1 %v371_v5 }
  0x83   : > { %387 = vmatpush.msra.mxu0 %v370_v6  ;;  %637 = vmatpush.msra.mxu1 %v370_v6 }
  0x85   : > { %388 = vmatpush.msra.mxu0 %v369_v7  ;;  %638 = vmatpush.msra.mxu1 %v369_v7 }
  0x87   : > { %389 = vmatpush.msra.mxu0 %v368_v8  ;;  %639 = vmatpush.msra.mxu1 %v368_v8 }
  0x89   : > { %390 = vmatpush.msra.mxu0 %v367_v9  ;;  %640 = vmatpush.msra.mxu1 %v367_v9 }
  0x8b   : > { %391 = vmatpush.msra.mxu0 %v366_v10  ;;  %641 = vmatpush.msra.mxu1 %v366_v10 }
  0x8d   : > { %392 = vmatpush.msra.mxu0 %v365_v11  ;;  %642 = vmatpush.msra.mxu1 %v365_v11 }
  0x8f   : > { %393 = vmatpush.msra.mxu0 %v364_v12  ;;  %643 = vmatpush.msra.mxu1 %v364_v12 }
  0x91   : > { %394 = vmatpush.msra.mxu0 %v363_v13  ;;  %644 = vmatpush.msra.mxu1 %v363_v13 }
  0x93   : > { %395 = vmatpush.msra.mxu0 %v362_v14  ;;  %645 = vmatpush.msra.mxu1 %v362_v14 }
  0x95   : > { %396 = vmatpush.msra.mxu0 %v361_v15  ;;  %646 = vmatpush.msra.mxu1 %v361_v15 }
  0x96   : > { %397 = vmatmul.f32.vlgmr.msra.gmra.mxu0 %v359_v16  ;;  %400 = vmatmul.f32.vlgmr.msra.gmra.mxu1 %v360_v17 }
 0x113   : > { %v398_v19 = vpop.f32.mrf.mxu0  ;;  %v401_v21 = vpop.f32.mrf.mxu1 }
 0x114   : > { %v399_v22 = vadd.f32 %v706_v18, %v398_v19  ;;  %v402_v24 = vadd.f32 %v706_v18, %v401_v21 }
 0x116   : > { %v406_v23 = vadd.f32 %v404_v20, %v399_v22  ;;  %v407_v27 = vadd.f32 %v405_v25, %v402_v24 }
 0x118   : > { %408 = vadd.xlane.f32.xlu0 %v406_v23  ;;  %v412_v26 = vmul.f32 %v406_v23, %v406_v23  ;;  %v413_v28 = vmul.f32 %v407_v27, %v407_v27 }
 0x11a   : > { %414 = vadd.xlane.f32.xlu1 %v412_v26 }
 0x120   : > { %410 = vadd.xlane.f32.xlu0 %v407_v27 }
 0x122   : > { %416 = vadd.xlane.f32.xlu1 %v413_v28 }
 0x18b   : > { %v409_v29 = vpop.xlane.xlu0 %408 }
 0x18c   : > { %v418_v30 = vmul.f32 0.0078125, %v409_v29 }
 0x18d   : > { %v415_v31 = vpop.xlane.xlu1 %414 }
 0x18e   : > { %v422_v32 = vmul.f32 %v418_v30, %v418_v30  ;;  %v420_v33 = vmul.f32 0.0078125, %v415_v31  ;;  %v428_v52 = vsub.f32 %v406_v23, %v418_v30 }
 0x190   : > { %v424_v34 = vsub.f32 %v420_v33, %v422_v32 }
 0x192   : > { %v426_v35 = vmax.f32 %v424_v34, 0.0 }
 0x193   : > { %v411_v36 = vpop.xlane.xlu0 %410 }
 0x194   : > { %v430_v37 = vadd.f32 1e-12, %v426_v35  ;;  %v419_v38 = vmul.f32 0.0078125, %v411_v36 }
 0x195   : > { %v417_v39 = vpop.xlane.xlu1 %416 }
 0x196   : > { %709 = vrsqrt.f32 %v430_v37  ;;  %v423_v40 = vmul.f32 %v419_v38, %v419_v38  ;;  %v421_v41 = vmul.f32 0.0078125, %v417_v39  ;;  %vm438_vm1 = vweird.f32 %v430_v37 }
 0x197   : > { %v429_v0 = vsub.f32 %v407_v27, %v419_v38 }
 0x198   : > { %v425_v42 = vsub.f32 %v421_v41, %v423_v40 }
 0x19a   : > { %v427_v43 = vmax.f32 %v425_v42, 0.0 }
 0x19c   : > { %v710_v44 = vpop.eup %709  ;;  %v431_v46 = vadd.f32 1e-12, %v427_v43 }
 0x19d   : > { %v433_v45 = vmul.f32 %v710_v44, %v430_v37  ;;  %vm439_vm0 = vweird.f32 %v710_v44 }
 0x19e   : > { %711 = vrsqrt.f32 %v431_v46  ;;  %vm440_vm2 = vmor %vm438_vm1, %vm439_vm0  ;;  %vm448_vm4 = vweird.f32 %v431_v46 }
 0x19f   : > { %v434_v47 = vmul.f32 %v710_v44, %v433_v45 }
 0x1a1   : > { %v435_v48 = vmul.f32 0.5, %v434_v47 }
 0x1a3   : > { %v436_v49 = vsub.f32 1.5, %v435_v48 }
 0x1a4   : > { %v712_v50 = vpop.eup %711 }
 0x1a5   : > { %v437_v51 = vmul.f32 %v710_v44, %v436_v49  ;;  %v443_v54 = vmul.f32 %v712_v50, %v431_v46  ;;  %vm449_vm3 = vweird.f32 %v712_v50 }
 0x1a6   : > { %vm450_vm5 = vmor %vm448_vm4, %vm449_vm3 }
 0x1a7   : > { %v441_v55 = vsel %vm440_vm2, %v710_v44, %v437_v51  ;;  %v444_v58 = vmul.f32 %v712_v50, %v443_v54 }
 0x1a8   : > { %v452_v57 = vmul.f32 %v441_v55, %v428_v52 }
 0x1a9   : > { %v445_v60 = vmul.f32 0.5, %v444_v58 }
 0x1aa   : > { %v458_v59 = vmul.f32 %v707_v53, %v452_v57 }
 0x1ab   : > { %v446_v62 = vsub.f32 1.5, %v445_v60 }
 0x1ac   : > { %v464_v61 = vadd.f32 %v708_v56, %v458_v59 }
 0x1ad   : > { %v447_v63 = vmul.f32 %v712_v50, %v446_v62 }
 0x1ae   : > { %466 = vst [vmem:[%s343_s13] sm:$0xff] %v464_v61 }
 0x1af   : > { %v451_v1 = vsel %vm450_vm5, %v712_v50, %v447_v63 }
 0x1b0   : > { %v453_v2 = vmul.f32 %v451_v1, %v429_v0 }
 0x1b2   : > { %v459_v3 = vmul.f32 %v707_v53, %v453_v2  ;;  %475 = sbr.rel (!%p1254_p6) target bundleno = 470 (0x1d6), region = 60 }
 0x1b4   : > { %v465_v4 = vadd.f32 %v708_v56, %v459_v3 }
 0x1b6   : > { %467 = vst [vmem:[%s343_s13 + $0x8] sm:$0xff] %v465_v4 }
 0x1b7   : > { %s1268_s29 = smov (!%p478_p12, %s477_s29), 2 }
 0x1b8   : > { %s621_s16 = sshll.u32 %s1268_s29, 3 }
 0x1b9   : > { %s481_s7 = ssub.s32 16, %s621_s16 }
 0x1ba   : > { %s482_s19 = sshll.u32 %s481_s7, 4 }
 0x1bb   : > { %483 = vsyncadd %s469_s18, %s482_s19  ;;  %p1175_p2 = scmp.ne.s32.totalorder %s621_s16, 0  ;;  %s630_s9 = sshll.u32 %s976_s25, 4 }
 0x1bc   : > { %s486_s30 = scalar_lea.hbm %s1234_s6, %s630_s9  ;;  %s488_s8 = sshll.u32 %s343_s13, 4  ;;  %s1183_s8 = int_to_ptr.vmem [resolvable:$true] %s488_s8 }
 0x1bd   : > { %s490_s14 = sshll.u32 %s486_s30, 4  ;;  %s625_s15 = sshll.u32 %s1268_s29, 7  ;;  %s1185_s14 = int_to_ptr.hbm [resolvable:$true] %s490_s14 }
 0x1be   : > { %s821_s27 = sshra.s32 %s1183_s8, 4  ;;  %s823_s26 = sshrl.u32 %s625_s15, 4  ;;  %s822_s27 = int_to_ptr.vmem [resolvable:$true] %s821_s27 }
 0x1bf   : > { %s828_s12 = scalar_lea.vmem %s822_s27, %s823_s26  ;;  %s917_s25 = smov [#allocation8]  }
 0x1c0   : > { %p829_p7 = scmp.ne.s32.totalorder %s822_s27, %s828_s12  ;;  %s832_s28 = scalar_lea.vmem %s917_s25, 32 }
 0x1c1   : > { %p834_p0 = scmp.lt.s32.totalorder %s832_s28, %s828_s12 }
 0x1c2   : > { %p830_p10 = pnand %p829_p7, %p1175_p2 }
 0x1c4   : > { %p831_p1 = pneg %p830_p10 }
 0x1c6   : > { %p836_p3 = pnand %p834_p0, %p831_p1 }
 0x1c8   : > { %839 = shalt.err (!%p836_p3)
}
 0x1c9   : > { %s840_s13 = sshra.s32 %s1185_s14, 4  ;;  %s851_s9 = scalar_lea.hbm %s1234_s6, 24  ;;  %s841_s13 = int_to_ptr.hbm [resolvable:$true] %s840_s13 }
 0x1ca   : > { %s847_s16 = scalar_lea.hbm %s841_s13, %s823_s26  ;;  %p852_p11 = scmp.lt.s32.totalorder %s841_s13, %s1234_s6 }
 0x1cb   : > { %p848_p8 = scmp.ne.s32.totalorder %s841_s13, %s847_s16  ;;  %p853_p13 = scmp.lt.s32.totalorder %s851_s9, %s847_s16 }
 0x1cd   : > { %p849_p9 = pnand %p848_p8, %p1175_p2  ;;  %p854_p5 = por %p853_p13, %p852_p11 }
 0x1cf   : > { %p850_p4 = pneg %p849_p9 }
 0x1d1   : > { %p855_p6 = pnand %p854_p5, %p850_p4 }
 0x1d3   : > { %858 = shalt.err (!%p855_p6)
}
 0x1d4   : > { %s918_s30 = smov 128   ;;  %s919_s27 = smov 8  }
 0x1d5   : > { %496 = dma.vmem_to_hbm [thread:$0]  (%p1175_p2), %s1183_s8, %s625_s15, %s1185_s14, %s469_s18, %s918_s30, %s918_s30, %s919_s27  }
 0x1d6 PF: > { %s505_s26 = sand.u32 1, %s894_s21   ;;  %p1256_p12 = scmp.ne.s32.totalorder %s1246_s10, 0 }
 0x1d7   : > { %p1257_p7 = scmp.ge.s32.totalorder %s906_s24, 2  ;;  %s506_s12 = scalar_lea.sflag [#allocation4], %s505_s26 }
 0x1d9   : > { %p659_p10 = pnand %p1257_p7, %p1256_p12 }
 0x1db   : > { %p660_p1 = pneg %p659_p10 }
 0x1dd   : > { %889 = dma.done.wait (%p660_p1), %s506_s12, 256  }
 0x1de   : > { %891 = vsyncadd (%p660_p1), %s506_s12, 4294967040  ;;  %s1258_s24 = sld [smem:[#allocation13_spill]]  ;;  %s1260_s21 = smov %s898_s22 }
 0x1df   : > { %s1259_s17 = sld [smem:[#allocation14_spill]]  ;;  %s1261_s22 = smov %s902_s23 }
 0x1e4   : > { %p22_p0 = scmp.ge.s32.totalorder %s1258_s24, 4  }
 0x1e5   : > { %s1262_s23 = smov %s1259_s17 }
 0x1e6   :  { %24 = sbr.rel (!%p22_p0) target bundleno = 9 (0x9), region = 106 }
 0x1eb   :  { %512 = vsyncpa [#allocation3], 1 }
 0x1ec   :  { %514 = vsyncpa [#allocation3 + $0x1], 1 }
 0x1ed   :  { %515 = vsyncpa [#allocation6], 1 }
 0x1ee   :  { %517 = vsyncpa [#allocation6 + $0x1], 1 }
 0x1ef   :  { %518 = vsyncpa [#allocation4], 1 }
 0x1f0   :  { %520 = vsyncpa [#allocation4 + $0x1], 1 }

</bundles_post_ra>
